<compile_context>
chip_gen: v7x
topology: tpu7x:2x2x1
jax: 0.10.0
libtpu: 0.0.40
codegen_flags: <defaults>
</compile_context>

<pallas_src>
import jax
import jax.numpy as jnp
from jax.experimental import pallas as pl
from jax.experimental.pallas import tpu as pltpu

N_BATCH = 2
C_IN, C_OUT = 4, 6
H_IN = W_IN = 12
KH = KW = 3
H_CONV = W_CONV = H_IN - KH + 1                       # 10
POOL_K, POOL_S = 3, 2
H_POOL = W_POOL = (H_CONV - POOL_K) // POOL_S + 1     # 4
N_SPATIAL = H_POOL * W_POOL                           # 16
PATCH = C_IN * KH * KW                                # 36
FLAT = C_OUT * N_SPATIAL                              # 96
FC1, FC2, FC3 = 100, 84, 2
N_POOL_OFF = POOL_K * POOL_K                          # 9
P_COLS = N_SPATIAL * PATCH                            # 576
PAD = 128                                             # lane-dense slab width


def convnet_kernel(p_ref, wb_ref, bb_ref,
                   w1_ref, b1_ref, w2_ref, b2_ref, w3_ref, b3_ref,
                   out_ref):
    """Fused conv1+relu+maxpool (one bf16 MXU matmul + 8 vmax) + FC head.

    p_ref : (9*TN, 576) bf16 VMEM  pool-expanded im2col patches (batch tile)
    wb_ref: (576, 128)  bf16 VMEM  kron(I16, Wc) conv weight, zero-padded cols
    bb_ref: (1, 128)    f32  VMEM  conv bias tiled to the (s, c) column order
    w*_ref: (128, 128)  f32  VMEM  FC weights, (in, out), zero-padded to 128
    b*_ref: (1, 128)    f32  VMEM  FC biases, zero-padded to 128
    out   : (TN, 128)   f32        lane-dense logits; real logits in [:, :2]
    """
    tn = out_ref.shape[0]

    # conv1 (+ bias + ReLU) for all 9 pool offsets at once: one MXU matmul,
    # native bf16 operands, f32 accumulation.
    y = jnp.dot(p_ref[...], wb_ref[...], preferred_element_type=jnp.float32)
    y = jnp.maximum(y + bb_ref[...], 0.0)                     # (9*TN, 128)

    # maxpool 3x3 stride 2 == elementwise max over the 9 pool-offset slabs.
    # TN is a multiple of 8, so each slab is a whole-vreg (8,128)-aligned
    # block -> pure VPU vmax, no sublane shuffles or VMEM copies.
    feat = y[0:tn, :]
    for k in range(1, N_POOL_OFF):
        feat = jnp.maximum(feat, y[k * tn:(k + 1) * tn, :])   # (TN, 128)

    # Fully connected head; every slab stays 128-lane dense in registers.
    h = jnp.dot(feat, w1_ref[...], preferred_element_type=jnp.float32)
    h = jnp.maximum(h + b1_ref[...], 0.0)
    h = jnp.dot(h, w2_ref[...], preferred_element_type=jnp.float32)
    h = jnp.maximum(h + b2_ref[...], 0.0)
    out = jnp.dot(h, w3_ref[...], preferred_element_type=jnp.float32)
    out_ref[...] = out + b3_ref[...]


def _pad_and_tile(n):
    """Pick padded batch and batch-tile size (multiple of 8, capped at 128).

    A TN=128 bf16 P tile is 9*128*576*2 B ~= 1.3 MiB (2.6 MiB double
    buffered) which comfortably fits v7x's 64 MiB physical / 32 MiB scoped
    VMEM as well as v5e's 16 MiB scoped default, while being large enough to
    amortize the ~0.35 us per-grid-step overhead.
    """
    tn = 128 if n > 128 else max(8, ((n + 7) // 8) * 8)
    n_pad = ((n + tn - 1) // tn) * tn
    return n_pad, tn


def _pool_expanded_patches(x, n_pad, tn):
    """(N, 4, 12, 12) NCHW -> (T*9*TN, 576) bf16 pool-expanded im2col matrix.

    Within batch tile t, row index = k*TN + n_local  (k = pi*3 + pj pool
    offset, sample = t*TN + n_local); column index = s*36 + p with
    s = oi*4 + oj, p = ic*9 + di*3 + dj, and
    entry = x[n, ic, 2*oi + pi + di, 2*oj + pj + dj].
    """
    n = x.shape[0]
    if n_pad != n:
        x = jnp.pad(x, ((0, n_pad - n), (0, 0), (0, 0), (0, 0)))
    # conv im2col: cols[n, I, J, ic*9 + di*3 + dj] = x[n, ic, I+di, J+dj]
    cols = jnp.stack(
        [x[:, :, di:di + H_CONV, dj:dj + W_CONV]
         for di in range(KH) for dj in range(KW)], axis=-1)     # (Np,4,10,10,9)
    cols = cols.transpose(0, 2, 3, 1, 4).reshape(n_pad, H_CONV, W_CONV, PATCH)
    # pool expansion: big[pi*3+pj, n, oi, oj, :] = cols[n, 2*oi+pi, 2*oj+pj, :]
    big = jnp.stack(
        [cols[:, pi:pi + POOL_S * H_POOL:POOL_S,
                 pj:pj + POOL_S * W_POOL:POOL_S, :]
         for pi in range(POOL_K) for pj in range(POOL_K)], axis=0)  # (9,Np,4,4,36)
    big = big.reshape(N_POOL_OFF, n_pad // tn, tn, P_COLS)
    big = big.transpose(1, 0, 2, 3)                              # (T,9,TN,576)
    # TODO(synk): pass the (N, 100, 36) im2col 'cols' instead and do the 9-way
    # pool-offset slicing in VMEM to avoid the 9x pool duplication in HBM.
    return big.reshape((n_pad // tn) * N_POOL_OFF * tn, P_COLS).astype(jnp.bfloat16)


def prepare_params(cw, cb, w1, b1, w2, b2, w3, b3):
    """One-time weight preprocessing (hoisted out of the per-call forward)."""
    f32 = jnp.float32
    # Block-diagonal conv weight kron(I16, Wc): columns ordered s*6 + c,
    # zero-padded to 128 lanes; bf16 for the native MXU path.
    wc = cw.reshape(C_OUT, PATCH).T.astype(f32)                        # (36, 6)
    wb = jnp.kron(jnp.eye(N_SPATIAL, dtype=f32), wc)                   # (576, 96)
    wb = jnp.pad(wb, ((0, 0), (0, PAD - FLAT))).astype(jnp.bfloat16)   # (576,128)
    bb = jnp.pad(jnp.tile(cb.astype(f32), N_SPATIAL),
                 (0, PAD - FLAT)).reshape(1, PAD)

    # fc1 columns permuted so the kernel's HWC-ordered features (col = s*6+c)
    # match PyTorch's CHW flatten (col = c*16+s); all FC slabs padded to 128.
    s_idx = jnp.arange(N_SPATIAL)
    c_idx = jnp.arange(C_OUT)
    perm = (c_idx[None, :] * N_SPATIAL + s_idx[:, None]).reshape(-1)   # (96,)
    w1p = jnp.zeros((PAD, PAD), f32).at[:FLAT, :FC1].set(
        w1.astype(f32)[:, perm].T)
    b1p = jnp.zeros((1, PAD), f32).at[0, :FC1].set(b1.astype(f32))
    w2p = jnp.zeros((PAD, PAD), f32).at[:FC1, :FC2].set(w2.astype(f32).T)
    b2p = jnp.zeros((1, PAD), f32).at[0, :FC2].set(b2.astype(f32))
    w3p = jnp.zeros((PAD, PAD), f32).at[:FC2, :FC3].set(w3.astype(f32).T)
    b3p = jnp.zeros((1, PAD), f32).at[0, :FC3].set(b3.astype(f32))
    return (wb, bb, w1p, b1p, w2p, b2p, w3p, b3p)


def convnet_forward(x, params):
    n = x.shape[0]
    n_pad, tn = _pad_and_tile(n)
    t = n_pad // tn
    rows = N_POOL_OFF * tn

    p = _pool_expanded_patches(x.astype(jnp.float32), n_pad, tn)  # (t*rows, 576)
    wb, bb, w1p, b1p, w2p, b2p, w3p, b3p = params

    def wspec(shape):
        # Constant index_map -> VMEM resident across the whole grid.
        return pl.BlockSpec(shape, lambda i: (0, 0))

    out = pl.pallas_call(
        convnet_kernel,
        out_shape=jax.ShapeDtypeStruct((n_pad, PAD), jnp.float32),
        grid=(t,),
        in_specs=[
            pl.BlockSpec((rows, P_COLS), lambda i: (i, 0)),   # P (batch-tiled)
            wspec((P_COLS, PAD)),                             # wb
            wspec((1, PAD)),                                  # bb
            wspec((PAD, PAD)), wspec((1, PAD)),               # fc1
            wspec((PAD, PAD)), wspec((1, PAD)),               # fc2
            wspec((PAD, PAD)), wspec((1, PAD)),               # fc3
        ],
        out_specs=pl.BlockSpec((tn, PAD), lambda i: (i, 0)),
        compiler_params=pltpu.CompilerParams(
            dimension_semantics=("parallel",),        # v7x dual-TC sharding
            vmem_limit_bytes=32 * 1024 * 1024),
    )(p, wb, bb, w1p, b1p, w2p, b2p, w3p, b3p)

    return out[:n, :FC3]


def reference_forward(x, cw, cb, w1, b1, w2, b2, w3, b3):
    """Plain-JAX reference matching PyTorch semantics."""
    y = jax.lax.conv_general_dilated(
        x, cw, window_strides=(1, 1), padding="VALID",
        dimension_numbers=("NCHW", "OIHW", "NCHW"))
    y = jnp.maximum(y + cb[None, :, None, None], 0.0)
    y = jax.lax.reduce_window(
        y, -jnp.inf, jax.lax.max,
        window_dimensions=(1, 1, POOL_K, POOL_K),
        window_strides=(1, 1, POOL_S, POOL_S),
        padding="VALID")
    f = y.reshape(y.shape[0], -1)                    # (N, 96), C,H,W order
    h = jnp.maximum(f @ w1.T + b1, 0.0)
    h = jnp.maximum(h @ w2.T + b2, 0.0)
    return h @ w3.T + b3


if __name__ == "__main__":
    key = jax.random.PRNGKey(0)
    ks = jax.random.split(key, 9)

    def uinit(k, shape, fan_in):
        bound = 1.0 / (fan_in ** 0.5)
        return jax.random.uniform(k, shape, jnp.float32, -bound, bound)

    # Parameters in PyTorch convention: Conv2d (O,I,kH,kW), Linear (out,in).
    cw = uinit(ks[0], (C_OUT, C_IN, KH, KW), C_IN * KH * KW)
    cb = uinit(ks[1], (C_OUT,), C_IN * KH * KW)
    w1 = uinit(ks[2], (FC1, FLAT), FLAT)
    b1 = uinit(ks[3], (FC1,), FLAT)
    w2 = uinit(ks[4], (FC2, FC1), FC1)
    b2 = uinit(ks[5], (FC2,), FC1)
    w3 = uinit(ks[6], (FC3, FC2), FC2)
    b3 = uinit(ks[7], (FC3,), FC2)

    x = jax.random.normal(ks[8], (N_BATCH, C_IN, H_IN, W_IN), jnp.float32)

    # Weight preprocessing runs ONCE here, not per forward call.
    params = jax.tree_util.tree_map(
        jax.block_until_ready, prepare_params(cw, cb, w1, b1, w2, b2, w3, b3))

    fwd = jax.jit(convnet_forward)
    out = jax.block_until_ready(fwd(x, params))

    ref = jax.block_until_ready(
        reference_forward(x, cw, cb, w1, b1, w2, b2, w3, b3))

    assert out.shape == (N_BATCH, FC3), out.shape
    # bf16 patches/conv-weight => slightly looser tolerance than pure f32.
    assert jnp.allclose(out, ref, atol=2e-2, rtol=2e-2), (out, ref)
    print("KERNEL_OK")
</pallas_src>

<mosaic_0001>
module attributes {stable_mosaic.version = 11 : i64} {
  func.func @convnet_kernel(%arg0: i32, %arg1: memref<72x576xbf16, #tpu.memory_space<vmem>>, %arg2: memref<576x128xbf16, #tpu.memory_space<vmem>>, %arg3: memref<1x128xf32, #tpu.memory_space<vmem>>, %arg4: memref<128x128xf32, #tpu.memory_space<vmem>>, %arg5: memref<1x128xf32, #tpu.memory_space<vmem>>, %arg6: memref<128x128xf32, #tpu.memory_space<vmem>>, %arg7: memref<1x128xf32, #tpu.memory_space<vmem>>, %arg8: memref<128x128xf32, #tpu.memory_space<vmem>>, %arg9: memref<1x128xf32, #tpu.memory_space<vmem>>, %arg10: memref<8x128xf32, #tpu.memory_space<vmem>>) attributes {dimension_semantics = [#tpu.dimension_semantics<parallel>], iteration_bounds = array<i64: 1>, scalar_prefetch = 0 : i64, scratch_operands = 0 : i64, tpu.core_type = #tpu.core_type<tc>, window_params = [{transform_indices = @transform_0, window_bounds = array<i64: 72, 576>}, {pipeline_mode = #tpu.pipeline_mode<synchronous>, transform_indices = @transform_1, window_bounds = array<i64: 576, 128>}, {pipeline_mode = #tpu.pipeline_mode<synchronous>, transform_indices = @transform_2, window_bounds = array<i64: 1, 128>}, {pipeline_mode = #tpu.pipeline_mode<synchronous>, transform_indices = @transform_3, window_bounds = array<i64: 128, 128>}, {pipeline_mode = #tpu.pipeline_mode<synchronous>, transform_indices = @transform_4, window_bounds = array<i64: 1, 128>}, {pipeline_mode = #tpu.pipeline_mode<synchronous>, transform_indices = @transform_5, window_bounds = array<i64: 128, 128>}, {pipeline_mode = #tpu.pipeline_mode<synchronous>, transform_indices = @transform_6, window_bounds = array<i64: 1, 128>}, {pipeline_mode = #tpu.pipeline_mode<synchronous>, transform_indices = @transform_7, window_bounds = array<i64: 128, 128>}, {pipeline_mode = #tpu.pipeline_mode<synchronous>, transform_indices = @transform_8, window_bounds = array<i64: 1, 128>}, {transform_indices = @transform_9, window_bounds = array<i64: 8, 128>}]} {
    %c0 = arith.constant 0 : index
    %c0_0 = arith.constant 0 : index
    %0 = vector.load %arg1[%c0, %c0_0] : memref<72x576xbf16, #tpu.memory_space<vmem>>, vector<72x576xbf16>
    %c0_1 = arith.constant 0 : index
    %c0_2 = arith.constant 0 : index
    %1 = vector.load %arg2[%c0_1, %c0_2] : memref<576x128xbf16, #tpu.memory_space<vmem>>, vector<576x128xbf16>
    %cst = arith.constant dense<0.000000e+00> : vector<72x128xf32>
    %2 = tpu.matmul %0, %1, %cst {dimension_numbers = #tpu.dot_dimension_numbers<[1], [0], [0], [1], [0, 0, 1, 1], [], []>} : vector<72x576xbf16>, vector<576x128xbf16>, vector<72x128xf32> -> vector<72x128xf32>
    %c0_3 = arith.constant 0 : index
    %c0_4 = arith.constant 0 : index
    %3 = vector.load %arg3[%c0_3, %c0_4] : memref<1x128xf32, #tpu.memory_space<vmem>>, vector<1x128xf32>
    %4 = vector.broadcast %3 : vector<1x128xf32> to vector<72x128xf32>
    %5 = arith.addf %2, %4 : vector<72x128xf32>
    %cst_5 = arith.constant 0.000000e+00 : f32
    %6 = vector.broadcast %cst_5 : f32 to vector<72x128xf32>
    %7 = arith.maximumf %5, %6 : vector<72x128xf32>
    %8 = vector.extract_strided_slice %7 {offsets = [0, 0], sizes = [8, 128], strides = [1, 1]} : vector<72x128xf32> to vector<8x128xf32>
    %9 = vector.extract_strided_slice %7 {offsets = [8, 0], sizes = [8, 128], strides = [1, 1]} : vector<72x128xf32> to vector<8x128xf32>
    %10 = arith.maximumf %8, %9 : vector<8x128xf32>
    %11 = vector.extract_strided_slice %7 {offsets = [16, 0], sizes = [8, 128], strides = [1, 1]} : vector<72x128xf32> to vector<8x128xf32>
    %12 = arith.maximumf %10, %11 : vector<8x128xf32>
    %13 = vector.extract_strided_slice %7 {offsets = [24, 0], sizes = [8, 128], strides = [1, 1]} : vector<72x128xf32> to vector<8x128xf32>
    %14 = arith.maximumf %12, %13 : vector<8x128xf32>
    %15 = vector.extract_strided_slice %7 {offsets = [32, 0], sizes = [8, 128], strides = [1, 1]} : vector<72x128xf32> to vector<8x128xf32>
    %16 = arith.maximumf %14, %15 : vector<8x128xf32>
    %17 = vector.extract_strided_slice %7 {offsets = [40, 0], sizes = [8, 128], strides = [1, 1]} : vector<72x128xf32> to vector<8x128xf32>
    %18 = arith.maximumf %16, %17 : vector<8x128xf32>
    %19 = vector.extract_strided_slice %7 {offsets = [48, 0], sizes = [8, 128], strides = [1, 1]} : vector<72x128xf32> to vector<8x128xf32>
    %20 = arith.maximumf %18, %19 : vector<8x128xf32>
    %21 = vector.extract_strided_slice %7 {offsets = [56, 0], sizes = [8, 128], strides = [1, 1]} : vector<72x128xf32> to vector<8x128xf32>
    %22 = arith.maximumf %20, %21 : vector<8x128xf32>
    %23 = vector.extract_strided_slice %7 {offsets = [64, 0], sizes = [8, 128], strides = [1, 1]} : vector<72x128xf32> to vector<8x128xf32>
    %24 = arith.maximumf %22, %23 : vector<8x128xf32>
    %c0_6 = arith.constant 0 : index
    %c0_7 = arith.constant 0 : index
    %25 = vector.load %arg4[%c0_6, %c0_7] : memref<128x128xf32, #tpu.memory_space<vmem>>, vector<128x128xf32>
    %cst_8 = arith.constant dense<0.000000e+00> : vector<8x128xf32>
    %26 = tpu.matmul %24, %25, %cst_8 {dimension_numbers = #tpu.dot_dimension_numbers<[1], [0], [0], [1], [0, 0, 1, 1], [], []>} : vector<8x128xf32>, vector<128x128xf32>, vector<8x128xf32> -> vector<8x128xf32>
    %c0_9 = arith.constant 0 : index
    %c0_10 = arith.constant 0 : index
    %27 = vector.load %arg5[%c0_9, %c0_10] : memref<1x128xf32, #tpu.memory_space<vmem>>, vector<1x128xf32>
    %28 = vector.broadcast %27 : vector<1x128xf32> to vector<8x128xf32>
    %29 = arith.addf %26, %28 : vector<8x128xf32>
    %cst_11 = arith.constant 0.000000e+00 : f32
    %30 = vector.broadcast %cst_11 : f32 to vector<8x128xf32>
    %31 = arith.maximumf %29, %30 : vector<8x128xf32>
    %c0_12 = arith.constant 0 : index
    %c0_13 = arith.constant 0 : index
    %32 = vector.load %arg6[%c0_12, %c0_13] : memref<128x128xf32, #tpu.memory_space<vmem>>, vector<128x128xf32>
    %cst_14 = arith.constant dense<0.000000e+00> : vector<8x128xf32>
    %33 = tpu.matmul %31, %32, %cst_14 {dimension_numbers = #tpu.dot_dimension_numbers<[1], [0], [0], [1], [0, 0, 1, 1], [], []>} : vector<8x128xf32>, vector<128x128xf32>, vector<8x128xf32> -> vector<8x128xf32>
    %c0_15 = arith.constant 0 : index
    %c0_16 = arith.constant 0 : index
    %34 = vector.load %arg7[%c0_15, %c0_16] : memref<1x128xf32, #tpu.memory_space<vmem>>, vector<1x128xf32>
    %35 = vector.broadcast %34 : vector<1x128xf32> to vector<8x128xf32>
    %36 = arith.addf %33, %35 : vector<8x128xf32>
    %cst_17 = arith.constant 0.000000e+00 : f32
    %37 = vector.broadcast %cst_17 : f32 to vector<8x128xf32>
    %38 = arith.maximumf %36, %37 : vector<8x128xf32>
    %c0_18 = arith.constant 0 : index
    %c0_19 = arith.constant 0 : index
    %39 = vector.load %arg8[%c0_18, %c0_19] : memref<128x128xf32, #tpu.memory_space<vmem>>, vector<128x128xf32>
    %cst_20 = arith.constant dense<0.000000e+00> : vector<8x128xf32>
    %40 = tpu.matmul %38, %39, %cst_20 {dimension_numbers = #tpu.dot_dimension_numbers<[1], [0], [0], [1], [0, 0, 1, 1], [], []>} : vector<8x128xf32>, vector<128x128xf32>, vector<8x128xf32> -> vector<8x128xf32>
    %c0_21 = arith.constant 0 : index
    %c0_22 = arith.constant 0 : index
    %41 = vector.load %arg9[%c0_21, %c0_22] : memref<1x128xf32, #tpu.memory_space<vmem>>, vector<1x128xf32>
    %42 = vector.broadcast %41 : vector<1x128xf32> to vector<8x128xf32>
    %43 = arith.addf %40, %42 : vector<8x128xf32>
    %c0_23 = arith.constant 0 : index
    %c0_24 = arith.constant 0 : index
    %44 = vector.load %arg10[%c0_23, %c0_24] : memref<8x128xf32, #tpu.memory_space<vmem>>, vector<8x128xf32>
    tpu.vector_store %arg10[%c0_23, %c0_24], %43 {strides = array<i32>} : memref<8x128xf32, #tpu.memory_space<vmem>>, vector<8x128xf32>,
    return
  }
  func.func @transform_0(%arg0: i32) -> (i32, i32) {
    %c0_i32 = arith.constant 0 : i32
    %c0_i32_0 = arith.constant 0 : i32
    return %arg0, %c0_i32 : i32, i32
  }
  func.func @transform_1(%arg0: i32) -> (i32, i32) {
    %c0_i32 = arith.constant 0 : i32
    %c0_i32_0 = arith.constant 0 : i32
    %c0_i32_1 = arith.constant 0 : i32
    return %c0_i32, %c0_i32_0 : i32, i32
  }
  func.func @transform_2(%arg0: i32) -> (i32, i32) {
    %c0_i32 = arith.constant 0 : i32
    %c0_i32_0 = arith.constant 0 : i32
    %c0_i32_1 = arith.constant 0 : i32
    return %c0_i32, %c0_i32_0 : i32, i32
  }
  func.func @transform_3(%arg0: i32) -> (i32, i32) {
    %c0_i32 = arith.constant 0 : i32
    %c0_i32_0 = arith.constant 0 : i32
    %c0_i32_1 = arith.constant 0 : i32
    return %c0_i32, %c0_i32_0 : i32, i32
  }
  func.func @transform_4(%arg0: i32) -> (i32, i32) {
    %c0_i32 = arith.constant 0 : i32
    %c0_i32_0 = arith.constant 0 : i32
    %c0_i32_1 = arith.constant 0 : i32
    return %c0_i32, %c0_i32_0 : i32, i32
  }
  func.func @transform_5(%arg0: i32) -> (i32, i32) {
    %c0_i32 = arith.constant 0 : i32
    %c0_i32_0 = arith.constant 0 : i32
    %c0_i32_1 = arith.constant 0 : i32
    return %c0_i32, %c0_i32_0 : i32, i32
  }
  func.func @transform_6(%arg0: i32) -> (i32, i32) {
    %c0_i32 = arith.constant 0 : i32
    %c0_i32_0 = arith.constant 0 : i32
    %c0_i32_1 = arith.constant 0 : i32
    return %c0_i32, %c0_i32_0 : i32, i32
  }
  func.func @transform_7(%arg0: i32) -> (i32, i32) {
    %c0_i32 = arith.constant 0 : i32
    %c0_i32_0 = arith.constant 0 : i32
    %c0_i32_1 = arith.constant 0 : i32
    return %c0_i32, %c0_i32_0 : i32, i32
  }
  func.func @transform_8(%arg0: i32) -> (i32, i32) {
    %c0_i32 = arith.constant 0 : i32
    %c0_i32_0 = arith.constant 0 : i32
    %c0_i32_1 = arith.constant 0 : i32
    return %c0_i32, %c0_i32_0 : i32, i32
  }
  func.func @transform_9(%arg0: i32) -> (i32, i32) {
    %c0_i32 = arith.constant 0 : i32
    %c0_i32_0 = arith.constant 0 : i32
    return %arg0, %c0_i32 : i32, i32
  }
}

</mosaic_0001>

<bundles_post_ra>
// kernel: convnet_forward.1
= control target key start
LH: loop header
LB: loop body
LE: loop exit
PB: predicated region body
PF: predicated region fallthrough
CT: control target
= control target key end

     0   :  { %v1506_v33 = vmov 0.0   ;;  %vm1507_vm0 = vmmov 0   ;;  %vm472_vm1 = vcmask 523264   ;;  %s1956_s1 = inlined_call_operand.vmem [shape: bf16[576,128], index: 1, kind: input, shape index: {}]   ;;  %s1957_s0 = inlined_call_operand.vmem [shape: bf16[72,576], index: 0, kind: input, shape index: {}]   ;;  %s1958_s3 = inlined_call_operand.vmem [shape: f32[128,128], index: 3, kind: input, shape index: {}]   ;;  %s1959_s2 = inlined_call_operand.vmem [shape: f32[1,128], index: 2, kind: input, shape index: {}]   ;;  %s1960_s5 = inlined_call_operand.vmem [shape: f32[128,128], index: 5, kind: input, shape index: {}]   ;;  %s1961_s7 = inlined_call_operand.vmem [shape: f32[128,128], index: 7, kind: input, shape index: {}]   ;;  %s1962_s4 = inlined_call_operand.vmem [shape: f32[1,128], index: 4, kind: input, shape index: {}]   ;;  %s1963_s6 = inlined_call_operand.vmem [shape: f32[1,128], index: 6, kind: input, shape index: {}]   ;;  %s1964_s8 = inlined_call_operand.vmem [shape: f32[1,128], index: 8, kind: input, shape index: {}]   ;;  %s1965_s9 = inlined_call_operand.vmem [shape: f32[8,128], index: 9, kind: output, shape index: {}]  }
   0x1   :  { %v1437_v0 = vld [vmem:[%s1956_s1 + $0x40] sm:$0xff]   ;;  %v1441_v4 = vld [vmem:[%s1956_s1 + $0x48] sm:$0xff]   ;;  %v1445_v8 = vld [vmem:[%s1956_s1 + $0x50] sm:$0xff]  }
   0x2   :  { %v1438_v1 = vld [vmem:[%s1956_s1] sm:$0xff]   ;;  %1077 = vmatprep.subr.bf16.mxu0 %v1437_v0  ;;  %v1442_v5 = vld [vmem:[%s1956_s1 + $0x8] sm:$0xff]   ;;  %v1446_v9 = vld [vmem:[%s1956_s1 + $0x10] sm:$0xff]   ;;  %v1508_v0 = vmov 0.0|0.0  }
   0x3   :  { %v1439_v2 = vld [vmem:[%s1956_s1 + $0xc0] sm:$0xff]   ;;  %1078 = vmatpush3.bf16.msra.mxu0 %v1438_v1  ;;  %v1443_v6 = vld [vmem:[%s1956_s1 + $0xc8] sm:$0xff]   ;;  %v1447_v10 = vld [vmem:[%s1956_s1 + $0xd0] sm:$0xff]  }
   0x4   :  { %v1440_v3 = vld [vmem:[%s1956_s1 + $0x80] sm:$0xff]   ;;  %1123 = vmatprep.subr.bf16.mxu1 %v1439_v2  ;;  %1079 = vmatprep.subr.bf16.mxu0 %v1441_v4  ;;  %v1444_v7 = vld [vmem:[%s1956_s1 + $0x88] sm:$0xff]   ;;  %v1448_v11 = vld [vmem:[%s1956_s1 + $0x90] sm:$0xff]  }
   0x5   :  { %1124 = vmatpush3.bf16.msra.mxu1 %v1440_v3  ;;  %v1449_v12 = vld [vmem:[%s1956_s1 + $0x58] sm:$0xff]   ;;  %v1453_v16 = vld [vmem:[%s1956_s1 + $0x60] sm:$0xff]   ;;  %v1457_v20 = vld [vmem:[%s1956_s1 + $0x68] sm:$0xff]  }
   0x6   :  { %1125 = vmatprep.subr.bf16.mxu1 %v1443_v6  ;;  %v1450_v13 = vld [vmem:[%s1956_s1 + $0x18] sm:$0xff]   ;;  %v1454_v17 = vld [vmem:[%s1956_s1 + $0x20] sm:$0xff]   ;;  %v1458_v21 = vld [vmem:[%s1956_s1 + $0x28] sm:$0xff]  }
   0x7   :  { %1080 = vmatpush3.bf16.msra.mxu0 %v1442_v5  ;;  %v1451_v14 = vld [vmem:[%s1956_s1 + $0xd8] sm:$0xff]   ;;  %v1455_v18 = vld [vmem:[%s1956_s1 + $0xe0] sm:$0xff]   ;;  %v1459_v22 = vld [vmem:[%s1956_s1 + $0xe8] sm:$0xff]  }
   0x8   :  { %1081 = vmatprep.subr.bf16.mxu0 %v1445_v8  ;;  %v1452_v15 = vld [vmem:[%s1956_s1 + $0x98] sm:$0xff]   ;;  %v1456_v19 = vld [vmem:[%s1956_s1 + $0xa0] sm:$0xff]   ;;  %v1460_v23 = vld [vmem:[%s1956_s1 + $0xa8] sm:$0xff]  }
   0x9   :  { %1126 = vmatpush3.bf16.msra.mxu1 %v1444_v7  ;;  %v1461_v24 = vld [vmem:[%s1956_s1 + $0x70] sm:$0xff]   ;;  %v1465_v28 = vld [vmem:[%s1956_s1 + $0x78] sm:$0xff]   ;;  %v1474_v36 = vld [vmem:[%s1957_s0 + $0xc] ss:$20 sps:$4 sm:$0xff]  }
   0xa   :  { %1127 = vmatprep.subr.bf16.mxu1 %v1447_v10  ;;  %v1462_v25 = vld [vmem:[%s1956_s1 + $0x30] sm:$0xff]   ;;  %v1466_v29 = vld [vmem:[%s1956_s1 + $0x38] sm:$0xff]   ;;  %v1475_v37 = vld [vmem:[%s1956_s1 + $0x100] sm:$0xff]   ;;  %592 = vmatprep.mubr.bf16.mxu1 %v1474_v36 }
   0xb   :  { %1082 = vmatpush3.bf16.msra.mxu0 %v1446_v9  ;;  %v1463_v26 = vld [vmem:[%s1956_s1 + $0xf0] sm:$0xff]   ;;  %v1467_v30 = vld [vmem:[%s1956_s1 + $0xf8] sm:$0xff]   ;;  %v1476_v38 = vld [vmem:[%s1957_s0 + $0x2c] ss:$20 sps:$4 sm:$0xff]  }
   0xc   :  { %1083 = vmatprep.subr.bf16.mxu0 %v1449_v12  ;;  %v1464_v27 = vld [vmem:[%s1956_s1 + $0xb0] sm:$0xff]   ;;  %v1470_v32 = vld [vmem:[%s1957_s0 + $0x4] ss:$20 sps:$4 sm:$0xff]   ;;  %v1472_v35 = vld [vmem:[%s1957_s0 + $0x8] ss:$20 sps:$4 sm:$0xff]  }
   0xd   :  { %1128 = vmatpush3.bf16.msra.mxu1 %v1448_v11  ;;  %v1468_v31 = vld [vmem:[%s1957_s0] ss:$20 sps:$4 sm:$0xff]   ;;  %v1471_v34 = vld [vmem:[%s1956_s1 + $0xb8] sm:$0xff]   ;;  %520 = vmatprep.mubr.bf16.mxu0 %v1470_v32  ;;  %v1482_v41 = vld [vmem:[%s1956_s1 + $0x108] sm:$0xff]  }
   0xe   :  { %1129 = vmatprep.subr.bf16.mxu1 %v1451_v14  ;;  %v1479_v39 = vld [vmem:[%s1957_s0 + $0x34] ss:$20 sps:$4 sm:$0xff]   ;;  %v1481_v43 = vld [vmem:[%s1957_s0 + $0x30] ss:$20 sps:$4 sm:$0xff]   ;;  %v1497_v46 = vld [vmem:[%s1956_s1 + $0x118] sm:$0xff]  }
   0xf   :  { %1084 = vmatpush3.bf16.msra.mxu0 %v1450_v13  ;;  %v1478_v40 = vld [vmem:[%s1957_s0 + $0x28] ss:$20 sps:$4 sm:$0xff]   ;;  %v1489_v44 = vld [vmem:[%s1956_s1 + $0x110] sm:$0xff]   ;;  %v1488_v49 = vld [vmem:[%s1957_s0 + $0x58] ss:$20 sps:$4 sm:$0xff]  }
  0x10   :  { %1085 = vmatprep.subr.bf16.mxu0 %v1453_v16  ;;  %v1483_v42 = vld [vmem:[%s1957_s0 + $0x54] ss:$20 sps:$4 sm:$0xff]   ;;  %v1486_v45 = vld [vmem:[%s1957_s0 + $0x5c] ss:$20 sps:$4 sm:$0xff]   ;;  %v1493_v50 = vld [vmem:[%s1957_s0 + $0x84] ss:$20 sps:$4 sm:$0xff]  }
  0x11   :  { %1130 = vmatpush3.bf16.msra.mxu1 %v1452_v15  ;;  %v1485_v47 = vld [vmem:[%s1957_s0 + $0x50] ss:$20 sps:$4 sm:$0xff]   ;;  %v1492_v52 = vld [vmem:[%s1957_s0 + $0x78] ss:$20 sps:$4 sm:$0xff]   ;;  %v1495_v55 = vld [vmem:[%s1957_s0 + $0x80] ss:$20 sps:$4 sm:$0xff]  }
  0x12   :  { %1131 = vmatprep.subr.bf16.mxu1 %v1455_v18  ;;  %v1490_v48 = vld [vmem:[%s1957_s0 + $0x7c] ss:$20 sps:$4 sm:$0xff]   ;;  %v57_v51 = vld [vmem:[%s1957_s0 + $0xa0] sm:$0xff]  ;;  %v58_v54 = vld [vmem:[%s1957_s0 + $0xa8] sm:$0xff] }
  0x13   :  { %1086 = vmatpush3.bf16.msra.mxu0 %v1454_v17  ;;  %v1029_v53 = vcombine.high %v57_v51, %v57_v51  ;;  %v1031_v56 = vcombine.high %v58_v54, %v58_v54  ;;  %v1028_v57 = vcombine.low %v57_v51, %v57_v51  ;;  %v1030_v58 = vcombine.low %v58_v54, %v58_v54  ;;  %v1501_v59 = vld [vmem:[%s1957_s0 + $0x10] ss:$20 sps:$4 sm:$0xff]   ;;  %v1502_v60 = vld [vmem:[%s1957_s0 + $0x38] ss:$20 sps:$4 sm:$0xff]   ;;  %v1503_v61 = vld [vmem:[%s1957_s0 + $0x60] ss:$20 sps:$4 sm:$0xff]  }
  0x14   :  { %1087 = vmatprep.subr.bf16.mxu0 %v1457_v20  ;;  %v1504_v62 = vld [vmem:[%s1957_s0 + $0x88] ss:$20 sps:$4 sm:$0xff]   ;;  %v1505_v63 = vld [vmem:[%s1957_s0 + $0xb0] ss:$0 sps:$4 sm:$0xff]   ;;  %v721_v1 = vld [vmem:[%s1958_s3] sm:$0xff] }
  0x15   :  { %1132 = vmatpush3.bf16.msra.mxu1 %v1456_v19  ;;  %v722_v2 = vld [vmem:[%s1958_s3 + $0x8] sm:$0xff]  ;;  %v723_v4 = vld [vmem:[%s1958_s3 + $0x10] sm:$0xff]  ;;  %v724_v5 = vld [vmem:[%s1958_s3 + $0x18] sm:$0xff] }
  0x16   :  { %1133 = vmatprep.subr.bf16.mxu1 %v1459_v22  ;;  %v1363_v3 = vpack.c.bf16 %v722_v2, %v721_v1  ;;  %v1366_v6 = vpack.c.bf16 %v724_v5, %v723_v4  ;;  %v725_v7 = vld [vmem:[%s1958_s3 + $0x20] sm:$0xff]  ;;  %v726_v8 = vld [vmem:[%s1958_s3 + $0x28] sm:$0xff]  ;;  %v727_v10 = vld [vmem:[%s1958_s3 + $0x30] sm:$0xff] }
  0x17   :  { %1088 = vmatpush3.bf16.msra.mxu0 %v1458_v21  ;;  %v1369_v9 = vpack.c.bf16 %v726_v8, %v725_v7  ;;  %v728_v11 = vld [vmem:[%s1958_s3 + $0x38] sm:$0xff]  ;;  %v729_v13 = vld [vmem:[%s1958_s3 + $0x40] sm:$0xff]  ;;  %v730_v14 = vld [vmem:[%s1958_s3 + $0x48] sm:$0xff] }
  0x18   :  { %1089 = vmatprep.subr.bf16.mxu0 %v1461_v24  ;;  %v1372_v12 = vpack.c.bf16 %v728_v11, %v727_v10  ;;  %v1375_v15 = vpack.c.bf16 %v730_v14, %v729_v13  ;;  %v731_v16 = vld [vmem:[%s1958_s3 + $0x50] sm:$0xff]  ;;  %v732_v17 = vld [vmem:[%s1958_s3 + $0x58] sm:$0xff]  ;;  %v733_v19 = vld [vmem:[%s1958_s3 + $0x60] sm:$0xff] }
  0x19   :  { %1134 = vmatpush3.bf16.msra.mxu1 %v1460_v23  ;;  %v1378_v18 = vpack.c.bf16 %v732_v17, %v731_v16  ;;  %v734_v20 = vld [vmem:[%s1958_s3 + $0x68] sm:$0xff]  ;;  %v735_v22 = vld [vmem:[%s1958_s3 + $0x70] sm:$0xff]  ;;  %v736_v23 = vld [vmem:[%s1958_s3 + $0x78] sm:$0xff] }
  0x1a   :  { %1135 = vmatprep.subr.bf16.mxu1 %v1463_v26  ;;  %v1381_v21 = vpack.c.bf16 %v734_v20, %v733_v19  ;;  %v1384_v24 = vpack.c.bf16 %v736_v23, %v735_v22  ;;  %v1815_v26 = vld [vmem:[%s1959_s2] ss:$0 sm:$0xff] }
  0x1b   :  { %1090 = vmatpush3.bf16.msra.mxu0 %v1462_v25 }
  0x1c   :  { %1091 = vmatprep.subr.bf16.mxu0 %v1465_v28 }
  0x1d   :  { %1136 = vmatpush3.bf16.msra.mxu1 %v1464_v27 }
  0x1e   :  { %1137 = vmatprep.subr.bf16.mxu1 %v1467_v30 }
  0x1f   :  { %1092 = vmatpush3.bf16.msra.mxu0 %v1466_v29 }
  0x20   :  { %1229 = vmatprep.subr.bf16.mxu0 %v1506_v33 }
  0x21   :  { %1138 = vmatpush3.bf16.msra.mxu1 %v1471_v34 }
  0x22   :  { %521 = vmatmul.mubr.bf16.vlgmr.msra.gmra.mrb[0].mxu0 %v1468_v31  ;;  %1362 = vmatprep.subr.bf16.mxu1 %v1508_v0 }
  0x23   :  { %1230 = vmatpush3.bf16.msra.mxu0 %v1475_v37  ;;  %528 = vmatprep.mubr.bf16.mxu0 %v1476_v38 }
  0x24   :  { %593 = vmatmul.mubr.bf16.vlgmr.msra.gmra.mrb[0].mxu1 %v1472_v35  ;;  %1231 = vmatprep.subr.bf16.mxu0 %v1506_v33 }
  0x25   :  { %600 = vmatprep.mubr.bf16.mxu1 %v1479_v39  ;;  %1364 = vmatpush3.bf16.msra.mxu1 %v1363_v3 }
  0x26   :  { %1365 = vmatprep.subr.bf16.mxu1 %v1508_v0 }
  0x27   :  { %1232 = vmatpush3.bf16.msra.mxu0 %v1482_v41 }
  0x28   :  { %1233 = vmatprep.subr.bf16.mxu0 %v1506_v33 }
  0x29   :  { %1367 = vmatpush3.bf16.msra.mxu1 %v1366_v6 }
  0x2a   :  { %529 = vmatmul.mubr.bf16.gmra.mrb[4].mxu0 %v1478_v40  ;;  %1368 = vmatprep.subr.bf16.mxu1 %v1508_v0 }
  0x2b   :  { %536 = vmatprep.mubr.bf16.mxu0 %v1483_v42  ;;  %1234 = vmatpush3.bf16.msra.mxu0 %v1489_v44 }
  0x2c   :  { %601 = vmatmul.mubr.bf16.gmra.mrb[4].mxu1 %v1481_v43  ;;  %1235 = vmatprep.subr.bf16.mxu0 %v1506_v33 }
  0x2d   :  { %608 = vmatprep.mubr.bf16.mxu1 %v1486_v45  ;;  %1370 = vmatpush3.bf16.msra.mxu1 %v1369_v9 }
  0x2e   :  { %1371 = vmatprep.subr.bf16.mxu1 %v1508_v0 }
  0x2f   :  { %1236 = vmatpush3.bf16.msra.mxu0 %v1497_v46 }
  0x30   :  { %1410 = vmatprep.subr.bf16.mxu0 %v1508_v0 }
  0x31   :  { %1373 = vmatpush3.bf16.msra.mxu1 %v1372_v12 }
  0x32   :  { %537 = vmatmul.mubr.bf16.gmra.mrb[8].mxu0 %v1485_v47  ;;  %1374 = vmatprep.subr.bf16.mxu1 %v1508_v0 }
  0x33   :  { %544 = vmatprep.mubr.bf16.mxu0 %v1490_v48 }
  0x34   :  { %609 = vmatmul.mubr.bf16.gmra.mrb[8].mxu1 %v1488_v49 }
  0x35   :  { %616 = vmatprep.mubr.bf16.mxu1 %v1493_v50  ;;  %1376 = vmatpush3.bf16.msra.mxu1 %v1375_v15 }
  0x36   :  { %1377 = vmatprep.subr.bf16.mxu1 %v1508_v0 }
  0x39   :  { %1379 = vmatpush3.bf16.msra.mxu1 %v1378_v18 }
  0x3a   :  { %545 = vmatmul.mubr.bf16.gmra.mrb[12].mxu0 %v1492_v52  ;;  %1380 = vmatprep.subr.bf16.mxu1 %v1508_v0 }
  0x3b   :  { %552 = vmatprep.mubr.bf16.mxu0 %v1029_v53 }
  0x3c   :  { %617 = vmatmul.mubr.bf16.gmra.mrb[12].mxu1 %v1495_v55 }
  0x3d   :  { %624 = vmatprep.mubr.bf16.mxu1 %v1031_v56  ;;  %1382 = vmatpush3.bf16.msra.mxu1 %v1381_v21 }
  0x3e   :  { %1383 = vmatprep.subr.bf16.mxu1 %v1508_v0 }
  0x41   :  { %1385 = vmatpush3.bf16.msra.mxu1 %v1384_v24 }
  0x42   :  { %553 = vmatmul.mubr.bf16.gmra.mrb[16].mxu0 %v1028_v57  ;;  %1386 = vmatprep.subr.bf16.mxu1 %v1508_v0 }
  0x43   :  { %1237 = vmatprep.mubr.msk.bf16.mxu0 %vm1507_vm0, %v1506_v33 }
  0x44   :  { %625 = vmatmul.mubr.bf16.gmra.mrb[16].mxu1 %v1030_v58 }
  0x45   :  { %1289 = vmatprep.mubr.msk.f32.mxu1 %vm1507_vm0, %v1506_v33 }
  0x4a   :  { %1238 = vmatmul.mubr.msk.bf16.vlgmr.msra.gmra.mrb[20].mxu0 %vm472_vm1, %v1501_v59 }
  0x4b   :  { %1241 = vmatprep.mubr.msk.bf16.mxu0 %vm1507_vm0, %v1506_v33 }
  0x52   :  { %1242 = vmatmul.mubr.msk.bf16.gmra.mrb[24].mxu0 %vm472_vm1, %v1502_v60 }
  0x53   :  { %1245 = vmatprep.mubr.msk.bf16.mxu0 %vm1507_vm0, %v1506_v33 }
  0x5a   :  { %1246 = vmatmul.mubr.msk.bf16.gmra.mrb[28].mxu0 %vm472_vm1, %v1503_v61 }
  0x5b   :  { %1249 = vmatprep.mubr.msk.bf16.mxu0 %vm1507_vm0, %v1506_v33 }
  0x62   :  { %1250 = vmatmul.mubr.msk.bf16.gmra.mrb[32].mxu0 %vm472_vm1, %v1504_v62 }
  0x63   :  { %1253 = vmatprep.mubr.msk.bf16.mxu0 %vm1507_vm0, %v1506_v33 }
  0x6a   :  { %1254 = vmatmul.mubr.msk.bf16.gmra.mrb[36].mxu0 %vm472_vm1, %v1505_v63 }
  0x6b   :  { %1359 = vmatprep.mubr.msk.f32.mxu0 %vm1507_vm0, %v1506_v33 }
  0xf5   :  { %v1093_v25 = vpop.f32.mrb[0].mxu0 }
  0xf6   :  { %v1094_v27 = vpop.f32.mrb[1].mxu0 }
  0xf7   :  { %v1095_v28 = vadd.f32 %v1094_v27, %v1093_v25  ;;  %v1096_v29 = vpop.f32.mrb[2].mxu0  ;;  %v1139_v30 = vpop.f32.mrb[0].mxu1 }
  0xf8   :  { %v1097_v31 = vpop.f32.mrb[3].mxu0  ;;  %v1140_v35 = vpop.f32.mrb[1].mxu1 }
  0xf9   :  { %v523_v32 = vadd.f32 %v1095_v28, %v1815_v26  ;;  %v1098_v34 = vadd.f32 %v1097_v31, %v1096_v29  ;;  %v1141_v36 = vadd.f32 %v1140_v35, %v1139_v30  ;;  %v1142_v37 = vpop.f32.mrb[2].mxu1 }
  0xfa   :  { %v1143_v39 = vpop.f32.mrb[3].mxu1 }
  0xfb   :  { %v526_v38 = vadd.f32 %v1098_v34, %v1815_v26  ;;  %v1144_v40 = vadd.f32 %v1143_v39, %v1142_v37  ;;  %v1819_v41 = vadd.f32 %v1141_v36, %v523_v32 }
  0xfd   :  { %v1099_v42 = vpop.f32.mrb[4].mxu0  ;;  %v1821_v44 = vadd.f32 %v1144_v40, %v526_v38 }
  0xfe   :  { %v1100_v43 = vpop.f32.mrb[5].mxu0 }
  0xff   :  { %v1101_v45 = vadd.f32 %v1100_v43, %v1099_v42  ;;  %v1102_v46 = vpop.f32.mrb[6].mxu0  ;;  %v1145_v47 = vpop.f32.mrb[4].mxu1 }
 0x100   :  { %v1103_v48 = vpop.f32.mrb[7].mxu0  ;;  %v1146_v51 = vpop.f32.mrb[5].mxu1 }
 0x101   :  { %v531_v49 = vadd.f32 %v1101_v45, %v1815_v26  ;;  %v1104_v50 = vadd.f32 %v1103_v48, %v1102_v46  ;;  %v1147_v52 = vadd.f32 %v1146_v51, %v1145_v47  ;;  %v1148_v53 = vpop.f32.mrb[6].mxu1 }
 0x102   :  { %v1149_v55 = vpop.f32.mrb[7].mxu1 }
 0x103   :  { %v534_v54 = vadd.f32 %v1104_v50, %v1815_v26  ;;  %v1150_v56 = vadd.f32 %v1149_v55, %v1148_v53  ;;  %v603_v57 = vadd.f32 %v1147_v52, %v531_v49 }
 0x105   :  { %v1105_v58 = vpop.f32.mrb[8].mxu0  ;;  %v606_v60 = vadd.f32 %v1150_v56, %v534_v54 }
 0x106   :  { %v1106_v59 = vpop.f32.mrb[9].mxu0 }
 0x107   :  { %v1107_v61 = vadd.f32 %v1106_v59, %v1105_v58  ;;  %v1108_v62 = vpop.f32.mrb[10].mxu0  ;;  %v1151_v63 = vpop.f32.mrb[8].mxu1 }
 0x108   :  { %v1109_v1 = vpop.f32.mrb[11].mxu0  ;;  %v1152_v4 = vpop.f32.mrb[9].mxu1 }
 0x109   :  { %v539_v2 = vadd.f32 %v1107_v61, %v1815_v26  ;;  %v1110_v3 = vadd.f32 %v1109_v1, %v1108_v62  ;;  %v1153_v5 = vadd.f32 %v1152_v4, %v1151_v63  ;;  %v1154_v6 = vpop.f32.mrb[10].mxu1 }
 0x10a   :  { %v1155_v8 = vpop.f32.mrb[11].mxu1 }
 0x10b   :  { %v542_v7 = vadd.f32 %v1110_v3, %v1815_v26  ;;  %v1156_v9 = vadd.f32 %v1155_v8, %v1154_v6  ;;  %v611_v10 = vadd.f32 %v1153_v5, %v539_v2 }
 0x10d   :  { %v1111_v11 = vpop.f32.mrb[12].mxu0  ;;  %v614_v13 = vadd.f32 %v1156_v9, %v542_v7 }
 0x10e   :  { %v1112_v12 = vpop.f32.mrb[13].mxu0 }
 0x10f   :  { %v1113_v14 = vadd.f32 %v1112_v12, %v1111_v11  ;;  %v1114_v15 = vpop.f32.mrb[14].mxu0  ;;  %v1157_v16 = vpop.f32.mrb[12].mxu1 }
 0x110   :  { %v1115_v17 = vpop.f32.mrb[15].mxu0  ;;  %v1158_v20 = vpop.f32.mrb[13].mxu1 }
 0x111   :  { %v547_v18 = vadd.f32 %v1113_v14, %v1815_v26  ;;  %v1116_v19 = vadd.f32 %v1115_v17, %v1114_v15  ;;  %v1159_v21 = vadd.f32 %v1158_v20, %v1157_v16  ;;  %v1160_v22 = vpop.f32.mrb[14].mxu1 }
 0x112   :  { %v1161_v24 = vpop.f32.mrb[15].mxu1 }
 0x113   :  { %v550_v23 = vadd.f32 %v1116_v19, %v1815_v26  ;;  %v1162_v25 = vadd.f32 %v1161_v24, %v1160_v22  ;;  %v619_v27 = vadd.f32 %v1159_v21, %v547_v18  ;;  %v816_v21 = vld [vmem:[%s1960_s5 + $0x8] sm:$0xff] }
 0x115   :  { %v1117_v28 = vpop.f32.mrb[16].mxu0  ;;  %v622_v30 = vadd.f32 %v1162_v25, %v550_v23 }
 0x116   :  { %v1118_v29 = vpop.f32.mrb[17].mxu0 }
 0x117   :  { %v1119_v31 = vadd.f32 %v1118_v29, %v1117_v28  ;;  %v1120_v32 = vpop.f32.mrb[18].mxu0  ;;  %v1163_v34 = vpop.f32.mrb[16].mxu1  ;;  %v817_v28 = vld [vmem:[%s1960_s5 + $0x10] sm:$0xff]  ;;  %v818_v29 = vld [vmem:[%s1960_s5 + $0x18] sm:$0xff] }
 0x118   :  { %v1121_v35 = vpop.f32.mrb[19].mxu0  ;;  %v1164_v37 = vpop.f32.mrb[17].mxu1  ;;  %v820_v32 = vld [vmem:[%s1960_s5 + $0x28] sm:$0xff] }
 0x119   :  { %v555_v36 = vadd.f32 %v1119_v31, %v1815_v26  ;;  %v1165_v38 = vadd.f32 %v1164_v37, %v1163_v34  ;;  %v1166_v39 = vpop.f32.mrb[18].mxu1  ;;  %v819_v31 = vld [vmem:[%s1960_s5 + $0x20] sm:$0xff]  ;;  %v821_v35 = vld [vmem:[%s1960_s5 + $0x30] sm:$0xff] }
 0x11a   :  { %v1167_v40 = vpop.f32.mrb[19].mxu1  ;;  %v1393_v34 = vpack.c.bf16 %v820_v32, %v819_v31  ;;  %v823_v37 = vld [vmem:[%s1960_s5 + $0x40] sm:$0xff] }
 0x11b   :  { %v627_v42 = vadd.f32 %v1165_v38, %v555_v36  ;;  %v824_v38 = vld [vmem:[%s1960_s5 + $0x48] sm:$0xff]  ;;  %v825_v40 = vld [vmem:[%s1960_s5 + $0x50] sm:$0xff] }
 0x11c   :  { %v1399_v39 = vpack.c.bf16 %v824_v38, %v823_v37 }
 0x11d   :  { %v666_v43 = vpop.f32.mrb[20].mxu0 }
 0x11e   :  { %v667_v45 = vadd.f32 %v666_v43, %v1819_v41  ;;  %v1239_v46 = vpop.f32.mrb[21].mxu0 }
 0x11f   :  { %v669_v47 = vpop.f32.mrb[22].mxu0  ;;  %v828_v46 = vld [vmem:[%s1960_s5 + $0x68] sm:$0xff] }
 0x120   :  { %v670_v48 = vadd.f32 %v669_v47, %v1821_v44  ;;  %v1240_v49 = vpop.f32.mrb[23].mxu0  ;;  %v704_v50 = vmax.f32 %v667_v45, 0.0  ;;  %v827_v45 = vld [vmem:[%s1960_s5 + $0x60] sm:$0xff] }
 0x121   :  { %v1405_v47 = vpack.c.bf16 %v828_v46, %v827_v45  ;;  %v830_v49 = vld [vmem:[%s1960_s5 + $0x78] sm:$0xff] }
 0x122   :  { %v705_v51 = vmax.f32 %v670_v48, 0.0  ;;  %v829_v48 = vld [vmem:[%s1960_s5 + $0x70] sm:$0xff] }
 0x124   :  { %v713_v52 = vmax.f32 %v704_v50, %v705_v51  ;;  %v1408_v50 = vpack.c.bf16 %v830_v49, %v829_v48  ;;  %v909_v51 = vld [vmem:[%s1961_s7] sm:$0xff] }
 0x125   :  { %v674_v53 = vpop.f32.mrb[24].mxu0 }
 0x126   :  { %v675_v54 = vadd.f32 %v674_v53, %v603_v57  ;;  %v1243_v55 = vpop.f32.mrb[25].mxu0  ;;  %v911_v53 = vld [vmem:[%s1961_s7 + $0x10] sm:$0xff] }
 0x127   :  { %v677_v26 = vpop.f32.mrb[26].mxu0  ;;  %v912_v55 = vld [vmem:[%s1961_s7 + $0x18] sm:$0xff] }
 0x128   :  { %v706_v56 = vmax.f32 %v675_v54, 0.0  ;;  %v678_v58 = vadd.f32 %v677_v26, %v606_v60  ;;  %v1244_v59 = vpop.f32.mrb[27].mxu0  ;;  %v1414_v26 = vpack.c.bf16 %v912_v55, %v911_v53 }
 0x12a   :  { %v714_v61 = vmax.f32 %v713_v52, %v706_v56  ;;  %v707_v62 = vmax.f32 %v678_v58, 0.0  ;;  %v910_v52 = vld [vmem:[%s1961_s7 + $0x8] sm:$0xff]  ;;  %v913_v56 = vld [vmem:[%s1961_s7 + $0x20] sm:$0xff] }
 0x12b   :  { %v1411_v54 = vpack.c.bf16 %v910_v52, %v909_v51  ;;  %v914_v58 = vld [vmem:[%s1961_s7 + $0x28] sm:$0xff] }
 0x12c   :  { %v715_v63 = vmax.f32 %v714_v61, %v707_v62  ;;  %v1417_v59 = vpack.c.bf16 %v914_v58, %v913_v56  ;;  %v915_v61 = vld [vmem:[%s1961_s7 + $0x30] sm:$0xff]  ;;  %v916_v62 = vld [vmem:[%s1961_s7 + $0x38] sm:$0xff] }
 0x12d   :  { %v682_v1 = vpop.f32.mrb[28].mxu0  ;;  %1412 = vmatpush3.bf16.msra.mxu0 %v1411_v54 }
 0x12e   :  { %v683_v41 = vadd.f32 %v682_v1, %v611_v10  ;;  %v1247_v2 = vpop.f32.mrb[29].mxu0  ;;  %1413 = vmatprep.subr.bf16.mxu0 %v1508_v0  ;;  %v917_v1 = vld [vmem:[%s1961_s7 + $0x40] sm:$0xff] }
 0x12f   :  { %v685_v3 = vpop.f32.mrb[30].mxu0 }
 0x130   :  { %v708_v4 = vmax.f32 %v683_v41, 0.0  ;;  %v686_v44 = vadd.f32 %v685_v3, %v614_v13  ;;  %v1248_v5 = vpop.f32.mrb[31].mxu0  ;;  %v815_v13 = vld [vmem:[%s1960_s5] sm:$0xff]  ;;  %v918_v41 = vld [vmem:[%s1961_s7 + $0x48] sm:$0xff]  ;;  %v919_v3 = vld [vmem:[%s1961_s7 + $0x50] sm:$0xff] }
 0x131   :  { %v1387_v25 = vpack.c.bf16 %v816_v21, %v815_v13  ;;  %1415 = vmatpush3.bf16.msra.mxu0 %v1414_v26  ;;  %v1423_v2 = vpack.c.bf16 %v918_v41, %v917_v1  ;;  %v921_v5 = vld [vmem:[%s1961_s7 + $0x60] sm:$0xff] }
 0x132   :  { %v716_v6 = vmax.f32 %v715_v63, %v708_v4  ;;  %v709_v7 = vmax.f32 %v686_v44, 0.0  ;;  %1416 = vmatprep.subr.bf16.mxu0 %v1508_v0  ;;  %v1420_v63 = vpack.c.bf16 %v916_v62, %v915_v61  ;;  %v920_v4 = vld [vmem:[%s1961_s7 + $0x58] sm:$0xff] }
 0x133   :  { %v1426_v44 = vpack.c.bf16 %v920_v4, %v919_v3 }
 0x134   :  { %v717_v8 = vmax.f32 %v716_v6, %v709_v7  ;;  %v922_v6 = vld [vmem:[%s1961_s7 + $0x68] sm:$0xff] }
 0x135   :  { %v690_v9 = vpop.f32.mrb[32].mxu0  ;;  %1418 = vmatpush3.bf16.msra.mxu0 %v1417_v59  ;;  %v1429_v7 = vpack.c.bf16 %v922_v6, %v921_v5 }
 0x136   :  { %v691_v57 = vadd.f32 %v690_v9, %v619_v27  ;;  %v1251_v11 = vpop.f32.mrb[33].mxu0  ;;  %1419 = vmatprep.subr.bf16.mxu0 %v1508_v0 }
 0x137   :  { %v693_v12 = vpop.f32.mrb[34].mxu0 }
 0x138   :  { %v710_v14 = vmax.f32 %v691_v57, 0.0  ;;  %v694_v60 = vadd.f32 %v693_v12, %v622_v30  ;;  %v1252_v15 = vpop.f32.mrb[35].mxu0  ;;  %v1390_v30 = vpack.c.bf16 %v818_v29, %v817_v28 }
 0x139   :  { %1421 = vmatpush3.bf16.msra.mxu0 %v1420_v63 }
 0x13a   :  { %v718_v16 = vmax.f32 %v717_v8, %v710_v14  ;;  %v711_v17 = vmax.f32 %v694_v60, 0.0  ;;  %1422 = vmatprep.subr.bf16.mxu0 %v1508_v0  ;;  %v1074_v8 = vld [vmem:[%s1962_s4] ss:$0 sm:$0xff]  ;;  %v923_v14 = vld [vmem:[%s1961_s7 + $0x70] sm:$0xff]  ;;  %v924_v60 = vld [vmem:[%s1961_s7 + $0x78] sm:$0xff] }
 0x13b   :  { %v1432_v15 = vpack.c.bf16 %v924_v60, %v923_v14 }
 0x13c   :  { %v719_v18 = vmax.f32 %v718_v16, %v711_v17 }
 0x13d   :  { %v698_v19 = vpop.f32.mrb[36].mxu0  ;;  %1424 = vmatpush3.bf16.msra.mxu0 %v1423_v2 }
 0x13e   :  { %v699_v10 = vadd.f32 %v698_v19, %v627_v42  ;;  %v1255_v20 = vpop.f32.mrb[37].mxu0  ;;  %v826_v42 = vld [vmem:[%s1960_s5 + $0x58] sm:$0xff]  ;;  %1425 = vmatprep.subr.bf16.mxu0 %v1508_v0 }
 0x13f   :  { %v701_v22 = vpop.f32.mrb[38].mxu0  ;;  %v1402_v43 = vpack.c.bf16 %v826_v42, %v825_v40 }
 0x140   :  { %v712_v23 = vmax.f32 %v699_v10, 0.0  ;;  %v1256_v24 = vpop.f32.mrb[39].mxu0  ;;  %v1076_v10 = vld [vmem:[%s1964_s8] ss:$0 sm:$0xff] }
 0x141   :  { %1427 = vmatpush3.bf16.msra.mxu0 %v1426_v44 }
 0x142   :  { %v720_v27 = vmax.f32 %v719_v18, %v712_v23  ;;  %1428 = vmatprep.subr.bf16.mxu0 %v1508_v0 }
 0x144   :  { %1290 = vmatmul.mubr.f32.vlgmr.msra.gmra.mrb[20].mxu1 %v720_v27 }
 0x145   :  { %1388 = vmatpush3.bf16.msra.mxu1 %v1387_v25  ;;  %1324 = vmatprep.mubr.msk.f32.mxu1 %vm1507_vm0, %v1506_v33  ;;  %v822_v33 = vld [vmem:[%s1960_s5 + $0x38] sm:$0xff] }
 0x146   :  { %1389 = vmatprep.subr.bf16.mxu1 %v1508_v0  ;;  %v1396_v36 = vpack.c.bf16 %v822_v33, %v821_v35  ;;  %1430 = vmatpush3.bf16.msra.mxu0 %v1429_v7 }
 0x147   :  { %1431 = vmatprep.subr.bf16.mxu0 %v1508_v0 }
 0x149   :  { %1391 = vmatpush3.bf16.msra.mxu1 %v1390_v30 }
 0x14a   :  { %1392 = vmatprep.subr.bf16.mxu1 %v1508_v0  ;;  %1433 = vmatpush3.bf16.msra.mxu0 %v1432_v15 }
 0x14d   :  { %1394 = vmatpush3.bf16.msra.mxu1 %v1393_v34 }
 0x14e   :  { %1395 = vmatprep.subr.bf16.mxu1 %v1508_v0 }
 0x151   :  { %1397 = vmatpush3.bf16.msra.mxu1 %v1396_v36 }
 0x152   :  { %1398 = vmatprep.subr.bf16.mxu1 %v1508_v0 }
 0x155   :  { %1400 = vmatpush3.bf16.msra.mxu1 %v1399_v39 }
 0x156   :  { %1401 = vmatprep.subr.bf16.mxu1 %v1508_v0 }
 0x159   :  { %1403 = vmatpush3.bf16.msra.mxu1 %v1402_v43 }
 0x15a   :  { %1404 = vmatprep.subr.bf16.mxu1 %v1508_v0 }
 0x15d   :  { %1406 = vmatpush3.bf16.msra.mxu1 %v1405_v47 }
 0x15e   :  { %1407 = vmatprep.subr.bf16.mxu1 %v1508_v0  ;;  %v1075_v0 = vld [vmem:[%s1963_s6] ss:$0 sm:$0xff] }
 0x161   :  { %1409 = vmatpush3.bf16.msra.mxu1 %v1408_v50 }
 0x217   :  { %v810_v9 = vpop.f32.mrb[20].mxu1 }
 0x218   :  { %v811_v57 = vadd.f32 %v1074_v8, %v810_v9  ;;  %v1291_v11 = vpop.f32.mrb[21].mxu1 }
 0x21a   :  { %v814_v12 = vmax.f32 %v811_v57, 0.0 }
 0x21c   :  { %1325 = vmatmul.mubr.f32.vlgmr.msra.gmra.mrb[22].mxu1 %v814_v12 }
 0x2ef   :  { %v904_v16 = vpop.f32.mrb[22].mxu1 }
 0x2f0   :  { %v905_v17 = vadd.f32 %v1075_v0, %v904_v16  ;;  %v1326_v18 = vpop.f32.mrb[23].mxu1 }
 0x2f2   :  { %v908_v19 = vmax.f32 %v905_v17, 0.0 }
 0x2f4   :  { %1360 = vmatmul.mubr.f32.vlgmr.msra.gmra.mrb[40].mxu0 %v908_v19 }
 0x3c7   :  { %v998_v20 = vpop.f32.mrb[40].mxu0 }
 0x3c8   :  { %v999_v13 = vadd.f32 %v1076_v10, %v998_v20  ;;  %v1361_v21 = vpop.f32.mrb[41].mxu0 }
 0x3ca   :  { %1002 = vst [vmem:[%s1965_s9] sm:$0xff] %v999_v13 }

</bundles_post_ra>
